<compile_context>
chip_gen: v5e
topology: v5e:2x2
jax: 0.10.0
libtpu: 0.0.40
codegen_flags: <defaults>
</compile_context>

<pallas_src>
import functools
import math

import jax
import jax.numpy as jnp
from jax.experimental import pallas as pl
from jax.experimental.pallas import tpu as pltpu


_VMEM_BUDGET = 40 << 20   # per-step working-set budget (fits v7x 64 MiB with headroom)
_VMEM_CAP = 48 << 20      # cap for vmem_limit_bytes (review: <= ~48 MiB on v7x)


def _round_up(v, m):
    return ((v + m - 1) // m) * m


def _vmem_bytes(BT, TR, NP, FP, HP, in_itemsize):
    """Real per-step VMEM footprint: double-buffered blocks + f32 intermediates."""
    adj_blk = 2 * TR * NP * in_itemsize              # adj row panel (pipelined)
    x_blk = 2 * NP * BT * FP * in_itemsize           # x batch tile (pipelined)
    out_blk = 2 * TR * BT * HP * 4                   # f32 output tile (pipelined)
    weights = 2 * (FP * HP * in_itemsize + BT * HP * 4)   # W + fused shift
    temps = TR * BT * (FP + HP) * 4                  # ax / y f32 temporaries
    return adj_blk + x_blk + out_blk + weights + temps


def _plan_tiles(B, N, FP, HP, in_itemsize):
    """Pick (BT, TR, NP) = (batch tile, adjacency row tile, padded node count).

    - maximizes the batch tile (fills MXU lanes, amortizes ~0.35us/step grid overhead),
    - prefers an even number of batch grid steps (v7x has 2 TensorCores),
    - keeps the whole padded adjacency resident only while it fits the VMEM budget,
      otherwise tiles adj into row panels so the N^2 block never has to sit in VMEM
      (required on v7x's 64 MiB for large graphs; also restores adj pipelining).
    """
    divisors = [d for d in range(B, 0, -1) if B % d == 0]
    for prefer_even in (True, False):
        for BT in divisors:
            steps_b = B // BT
            if prefer_even and steps_b > 1 and steps_b % 2 == 1:
                continue
            NP = _round_up(max(N, 8), 16)
            if _vmem_bytes(BT, NP, NP, FP, HP, in_itemsize) <= _VMEM_BUDGET:
                return BT, NP, NP                          # whole adj per step
            for TR in (512, 256, 128, 64, 32, 16):         # adj row panels
                NPt = _round_up(max(N, 8), TR)
                if _vmem_bytes(BT, TR, NPt, FP, HP, in_itemsize) <= _VMEM_BUDGET:
                    return BT, TR, NPt
    return 1, 16, _round_up(max(N, 8), 16)


def _gcn_kernel(bt, fp, hp, adj_first, x_ref, adj_ref, w_ref, shift_ref, out_ref):
    """Fused GraphConvolution + folded BatchNorm1d(eval) + ReLU for one tile.

    x_ref     (NP, BT*FP)  compute dtype; batch b lives in lanes [b*FP, (b+1)*FP)
    adj_ref   (TR, NP)     compute dtype (adjacency row panel)
    w_ref     (FP, HP)     compute dtype, BN scale folded in
    shift_ref (1, BT*HP)   f32; bias/mean/beta folded, pre-tiled per batch
    out_ref   (TR, BT*HP)  f32
    """
    w = w_ref[...]
    if adj_first:
        # ONE batched adjacency matmul for the whole batch tile (batch sits in lanes).
        ax = jnp.dot(adj_ref[...], x_ref[...],
                     preferred_element_type=jnp.float32).astype(w.dtype)
        # Per-batch feature matmuls: slices are 128-lane aligned -> full-lane MXU calls.
        y = jnp.concatenate(
            [jnp.dot(ax[:, b * fp:(b + 1) * fp], w,
                     preferred_element_type=jnp.float32) for b in range(bt)],
            axis=-1)                                        # (TR, BT*HP) f32
    else:
        # Fin_pad > H_pad: contract the narrower H in the adjacency matmul instead.
        s = jnp.concatenate(
            [jnp.dot(x_ref[:, b * fp:(b + 1) * fp], w,
                     preferred_element_type=jnp.float32).astype(w.dtype)
             for b in range(bt)], axis=-1)                  # (NP, BT*HP)
        y = jnp.dot(adj_ref[...], s, preferred_element_type=jnp.float32)
    # Single lane-dense store; shift broadcast + ReLU done once on the whole tile.
    out_ref[...] = jnp.maximum(y + shift_ref[...], 0.0).astype(out_ref.dtype)


def gcn_forward(x, adj, weight, bias, gamma, beta, running_mean, running_var, *,
                eps=1e-5, compute_dtype=jnp.bfloat16,
                block_batch=None, block_rows=None):
    """Pallas GCN.forward: (adj @ x @ W + b) -> BatchNorm1d(eval) -> ReLU.

    Returns (out, adj), matching the PyTorch module. BN scale is folded into W and
    (bias, running_mean, beta) into one shift, so the kernel is two MXU matmuls plus one
    VPU add/max per tile. MXU operands are fed in `compute_dtype` (bf16 by default; the
    0/1 adjacency is exact in bf16); accumulation and the shift stay in f32.
    """
    # TODO(synk): training-mode BatchNorm1d (batch statistics + running-stat updates) is
    # not implemented; this is inference-mode BN.
    B, N, Fin = x.shape
    H = weight.shape[1]
    assert weight.shape == (Fin, H) and adj.shape == (N, N)

    f32 = jnp.float32
    g = gamma.astype(f32) * jax.lax.rsqrt(running_var.astype(f32) + eps)      # (H,)
    w_eff = weight.astype(f32) * g[None, :]                                   # (Fin, H)
    shift = (bias.astype(f32) - running_mean.astype(f32)) * g + beta.astype(f32)

    FP = _round_up(Fin, 128)          # lane-pad features
    HP = _round_up(H, 128)            # lane-pad hidden -> unmasked, lane-dense stores
    in_it = jnp.dtype(compute_dtype).itemsize

    BT, TR, NP = _plan_tiles(B, N, FP, HP, in_it)
    if block_batch is not None:
        BT = block_batch
    if block_rows is not None:
        TR = block_rows
        NP = _round_up(max(N, 8), TR)
    assert B % BT == 0 and NP % TR == 0

    # Contract the narrower of (Fin_pad, H_pad) in the adjacency matmul; when adj is
    # row-tiled always go adj-first so x@W is never recomputed per row panel.
    adj_first = (FP <= HP) or (NP // TR > 1)

    # Wrapper-side layout (see module header): nodes on sublanes, batch*feat on lanes.
    xk = jnp.transpose(
        jnp.pad(x.astype(f32), ((0, 0), (0, NP - N), (0, FP - Fin))),
        (1, 0, 2)).reshape(NP, B * FP).astype(compute_dtype)
    adj_p = jnp.pad(adj.astype(f32), ((0, NP - N), (0, NP - N))).astype(compute_dtype)
    w_p = jnp.pad(w_eff, ((0, FP - Fin), (0, HP - H))).astype(compute_dtype)
    shift_p = jnp.tile(jnp.pad(shift, (0, HP - H))[None, :], (1, BT))  # (1, BT*HP) f32

    vmem_limit = int(min(_VMEM_CAP,
                         max(32 << 20,
                             _vmem_bytes(BT, TR, NP, FP, HP, in_it) + (8 << 20))))

    out_k = pl.pallas_call(
        functools.partial(_gcn_kernel, BT, FP, HP, adj_first),
        out_shape=jax.ShapeDtypeStruct((NP, B * HP), f32),
        grid_spec=pl.GridSpec(
            # Row-panel axis innermost: x / W / shift block indices are constant across
            # it, so Pallas does not re-DMA them per step (only adj/out blocks move).
            grid=(B // BT, NP // TR),
            in_specs=[
                pl.BlockSpec((NP, BT * FP), lambda i, j: (0, i)),   # x batch tile
                pl.BlockSpec((TR, NP), lambda i, j: (j, 0)),        # adj row panel
                pl.BlockSpec((FP, HP), lambda i, j: (0, 0)),        # W (BN folded)
                pl.BlockSpec((1, BT * HP), lambda i, j: (0, 0)),    # fused shift
            ],
            out_specs=pl.BlockSpec((TR, BT * HP), lambda i, j: (j, i)),
        ),
        compiler_params=pltpu.CompilerParams(
            dimension_semantics=("parallel", "parallel"),
            vmem_limit_bytes=vmem_limit),
    )(xk, adj_p, w_p, shift_p)

    out = out_k.reshape(NP, B, HP).transpose(1, 0, 2)[:, :N, :H].astype(x.dtype)
    return out, adj


def _reference_jax(x, adj, weight, bias, gamma, beta, running_mean, running_var,
                   *, eps=1e-5):
    """Plain-JAX mirror of GCN.forward (eval-mode BN) for correctness checking."""
    support = jnp.einsum("bnc,ch->bnh", x, weight)          # bmm(x, W)
    out = jnp.einsum("nm,bmh->bnh", adj, support) + bias    # bmm(adj, support) + bias
    out = (out - running_mean) * (gamma * jax.lax.rsqrt(running_var + eps)) + beta
    return jnp.maximum(out, 0.0)


if __name__ == "__main__":
    key = jax.random.PRNGKey(0)
    B, N, nfeat, nhid = 2, 8, 32, 64   # batch=2, nodes=8, in-features=32, hidden=64
    ks = jax.random.split(key, 8)

    # GraphConvolution.reset_parameters(): uniform(-stdv, stdv), stdv = 1/sqrt(out_features)
    stdv = 1.0 / math.sqrt(nhid)
    weight = jax.random.uniform(ks[0], (nfeat, nhid), jnp.float32, -stdv, stdv)
    bias = jax.random.uniform(ks[1], (nhid,), jnp.float32, -stdv, stdv)

    x = jax.random.normal(ks[2], (B, N, nfeat), jnp.float32)
    # Synthesized adjacency buffer (module loads it with np.load(mat_path)).
    adj = (jax.random.uniform(ks[3], (N, N), jnp.float32) > 0.5).astype(jnp.float32)

    # Non-trivial BatchNorm1d state so the BN path is actually exercised.
    gamma = 1.0 + 0.1 * jax.random.normal(ks[4], (nhid,), jnp.float32)
    beta = 0.1 * jax.random.normal(ks[5], (nhid,), jnp.float32)
    running_mean = 0.1 * jax.random.normal(ks[6], (nhid,), jnp.float32)
    running_var = jnp.abs(1.0 + 0.1 * jax.random.normal(ks[7], (nhid,), jnp.float32))

    ref = jax.block_until_ready(
        _reference_jax(x, adj, weight, bias, gamma, beta, running_mean, running_var))

    # Default bf16-MXU path (adj is 0/1, exact in bf16; x/W rounding -> loose tolerance).
    out, adj_out = gcn_forward(x, adj, weight, bias, gamma, beta,
                               running_mean, running_var)
    out = jax.block_until_ready(out)
    assert out.shape == (B, N, nhid)
    assert adj_out.shape == (N, N)
    err_bf16 = float(jnp.max(jnp.abs(out - ref)))
    assert err_bf16 < 1e-1, f"bf16 path: max abs err {err_bf16}"

    # f32-MXU path: tight check that the fused/folded math matches the reference.
    out32, _ = gcn_forward(x, adj, weight, bias, gamma, beta, running_mean, running_var,
                           compute_dtype=jnp.float32)
    out32 = jax.block_until_ready(out32)
    assert jnp.allclose(out32, ref, atol=1e-4, rtol=1e-4), \
        f"f32 path: max abs err {float(jnp.max(jnp.abs(out32 - ref)))}"

    print("KERNEL_OK")
</pallas_src>

<mosaic_0001>
module attributes {stable_mosaic.version = 11 : i64} {
  func.func @_gcn_kernel(%arg0: i32, %arg1: i32, %arg2: memref<16x256xbf16, #tpu.memory_space<vmem>>, %arg3: memref<16x16xbf16, #tpu.memory_space<vmem>>, %arg4: memref<128x128xbf16, #tpu.memory_space<vmem>>, %arg5: memref<1x256xf32, #tpu.memory_space<vmem>>, %arg6: memref<16x256xf32, #tpu.memory_space<vmem>>) attributes {dimension_semantics = [#tpu.dimension_semantics<parallel>, #tpu.dimension_semantics<parallel>], iteration_bounds = array<i64: 1, 1>, scalar_prefetch = 0 : i64, scratch_operands = 0 : i64, tpu.core_type = #tpu.core_type<tc>, window_params = [{transform_indices = @transform_0, window_bounds = array<i64: 16, 256>}, {transform_indices = @transform_1, window_bounds = array<i64: 16, 16>}, {pipeline_mode = #tpu.pipeline_mode<synchronous>, transform_indices = @transform_2, window_bounds = array<i64: 128, 128>}, {pipeline_mode = #tpu.pipeline_mode<synchronous>, transform_indices = @transform_3, window_bounds = array<i64: 1, 256>}, {transform_indices = @transform_4, window_bounds = array<i64: 16, 256>}]} {
    %c0 = arith.constant 0 : index
    %c0_0 = arith.constant 0 : index
    %0 = vector.load %arg4[%c0, %c0_0] : memref<128x128xbf16, #tpu.memory_space<vmem>>, vector<128x128xbf16>
    %c0_1 = arith.constant 0 : index
    %c0_2 = arith.constant 0 : index
    %1 = vector.load %arg3[%c0_1, %c0_2] : memref<16x16xbf16, #tpu.memory_space<vmem>>, vector<16x16xbf16>
    %c0_3 = arith.constant 0 : index
    %c0_4 = arith.constant 0 : index
    %2 = vector.load %arg2[%c0_3, %c0_4] : memref<16x256xbf16, #tpu.memory_space<vmem>>, vector<16x256xbf16>
    %cst = arith.constant dense<0.000000e+00> : vector<16x256xf32>
    %3 = tpu.matmul %1, %2, %cst {dimension_numbers = #tpu.dot_dimension_numbers<[1], [0], [0], [1], [0, 0, 1, 1], [], []>} : vector<16x16xbf16>, vector<16x256xbf16>, vector<16x256xf32> -> vector<16x256xf32>
    %4 = arith.truncf %3 : vector<16x256xf32> to vector<16x256xbf16>
    %5 = vector.extract_strided_slice %4 {offsets = [0, 0], sizes = [16, 128], strides = [1, 1]} : vector<16x256xbf16> to vector<16x128xbf16>
    %cst_5 = arith.constant dense<0.000000e+00> : vector<16x128xf32>
    %6 = tpu.matmul %5, %0, %cst_5 {dimension_numbers = #tpu.dot_dimension_numbers<[1], [0], [0], [1], [0, 0, 1, 1], [], []>} : vector<16x128xbf16>, vector<128x128xbf16>, vector<16x128xf32> -> vector<16x128xf32>
    %7 = vector.extract_strided_slice %4 {offsets = [0, 128], sizes = [16, 128], strides = [1, 1]} : vector<16x256xbf16> to vector<16x128xbf16>
    %cst_6 = arith.constant dense<0.000000e+00> : vector<16x128xf32>
    %8 = tpu.matmul %7, %0, %cst_6 {dimension_numbers = #tpu.dot_dimension_numbers<[1], [0], [0], [1], [0, 0, 1, 1], [], []>} : vector<16x128xbf16>, vector<128x128xbf16>, vector<16x128xf32> -> vector<16x128xf32>
    %9 = tpu.concatenate %6, %8 in 1 : vector<16x128xf32>, vector<16x128xf32> -> vector<16x256xf32>
    %c0_7 = arith.constant 0 : index
    %c0_8 = arith.constant 0 : index
    %10 = vector.load %arg5[%c0_7, %c0_8] : memref<1x256xf32, #tpu.memory_space<vmem>>, vector<1x256xf32>
    %11 = vector.broadcast %10 : vector<1x256xf32> to vector<16x256xf32>
    %12 = arith.addf %9, %11 : vector<16x256xf32>
    %cst_9 = arith.constant 0.000000e+00 : f32
    %13 = vector.broadcast %cst_9 : f32 to vector<16x256xf32>
    %14 = arith.maximumf %12, %13 : vector<16x256xf32>
    %c0_10 = arith.constant 0 : index
    %c0_11 = arith.constant 0 : index
    %15 = vector.load %arg6[%c0_10, %c0_11] : memref<16x256xf32, #tpu.memory_space<vmem>>, vector<16x256xf32>
    tpu.vector_store %arg6[%c0_10, %c0_11], %14 {strides = array<i32>} : memref<16x256xf32, #tpu.memory_space<vmem>>, vector<16x256xf32>,
    return
  }
  func.func @transform_0(%arg0: i32, %arg1: i32) -> (i32, i32) {
    %c0_i32 = arith.constant 0 : i32
    %c0_i32_0 = arith.constant 0 : i32
    return %c0_i32, %arg0 : i32, i32
  }
  func.func @transform_1(%arg0: i32, %arg1: i32) -> (i32, i32) {
    %c0_i32 = arith.constant 0 : i32
    %c0_i32_0 = arith.constant 0 : i32
    return %arg1, %c0_i32 : i32, i32
  }
  func.func @transform_2(%arg0: i32, %arg1: i32) -> (i32, i32) {
    %c0_i32 = arith.constant 0 : i32
    %c0_i32_0 = arith.constant 0 : i32
    %c0_i32_1 = arith.constant 0 : i32
    return %c0_i32, %c0_i32_0 : i32, i32
  }
  func.func @transform_3(%arg0: i32, %arg1: i32) -> (i32, i32) {
    %c0_i32 = arith.constant 0 : i32
    %c0_i32_0 = arith.constant 0 : i32
    %c0_i32_1 = arith.constant 0 : i32
    return %c0_i32, %c0_i32_0 : i32, i32
  }
  func.func @transform_4(%arg0: i32, %arg1: i32) -> (i32, i32) {
    %c0_i32 = arith.constant 0 : i32
    return %arg1, %arg0 : i32, i32
  }
}

</mosaic_0001>

<bundles_post_ra>
// kernel: tpu_custom_call.1
= control target key start
LH: loop header
LB: loop body
LE: loop exit
PB: predicated region body
PF: predicated region fallthrough
CT: control target
= control target key end

     0   :  { %9 = vsyncpa [#allocation3], 0  ;;  %s478_s0 = inlined_call_operand.hbm [shape: bf16[16,256], index: 0, kind: input, shape index: {}]   ;;  %s479_s1 = inlined_call_operand.hbm [shape: bf16[16,16], index: 1, kind: input, shape index: {}]   ;;  %s480_s2 = inlined_call_operand.hbm [shape: bf16[128,128], index: 2, kind: input, shape index: {}]   ;;  %s481_s3 = inlined_call_operand.vmem [shape: f32[1,256], index: 3, kind: input, shape index: {}]   ;;  %s482_s4 = inlined_call_operand.hbm [shape: f32[16,256], index: 4, kind: output, shape index: {}]  }
   0x1   :  { %10 = vsyncpa [#allocation6], 0  ;;  %s29_s17 = sshll.u32 %s479_s1, 4  ;;  %s30_s17 = int_to_ptr.hbm [resolvable:$true] %s29_s17 }
   0x2   :  { %11 = vsyncpa [#allocation4], 0  ;;  %s428_s18 = smov [#allocation5]   ;;  %s16_s22 = sshll.u32 %s478_s0, 4  ;;  %s17_s22 = int_to_ptr.hbm [resolvable:$true] %s16_s22 }
   0x3   :  { %s31_s19 = sshll.u32 %s428_s18, 4  ;;  %s429_s23 = smov 64   ;;  %s32_s19 = int_to_ptr.vmem [resolvable:$true] %s31_s19 }
   0x4   :  { %s430_s24 = smov 4   ;;  %s431_s25 = smov [#allocation2]  }
   0x5   :  { %37 = dma.hbm_to_vmem [thread:$0]  %s30_s17, 128, %s32_s19, [#allocation6], %s429_s23, %s429_s23, %s430_s24  }
   0x6   :  { %s18_s26 = sshll.u32 %s431_s25, 4  ;;  %s432_s27 = smov 128   ;;  %s19_s26 = int_to_ptr.vmem [resolvable:$true] %s18_s26 }
   0x7   :  { %s433_s28 = smov 8   ;;  %s42_s30 = sshll.u32 %s480_s2, 4  ;;  %s43_s30 = int_to_ptr.hbm [resolvable:$true] %s42_s30 }
   0x8   :  { %24 = dma.hbm_to_vmem [thread:$0]  %s17_s22, 256, %s19_s26, [#allocation3], %s432_s27, %s432_s27, %s433_s28  }
   0x9   :  { %s434_s5 = smov [#allocation7]  }
   0xa   :  { %s44_s6 = sshll.u32 %s434_s5, 4  ;;  %s45_s6 = int_to_ptr.vmem [resolvable:$true] %s44_s6 }
   0xb   :  { %50 = dma.hbm_to_vmem [thread:$0]  %s43_s30, 1024, %s45_s6, [#allocation6], %s429_s23, %s429_s23, %s430_s24  }
   0xc   :  { %422 = dma.done.wait [#allocation3], 256  }
   0xd   :  { %423 = vsyncadd [#allocation3], 4294967040 }
   0xe   :  { %424 = dma.done.wait [#allocation6], 1152  }
   0xf   :  { %425 = vsyncadd [#allocation6], 4294966144  ;;  %v265_v0 = vld [vmem:[#allocation2] sm:$0xf]  ;;  %v315_v1 = vld [vmem:[#allocation2 + $0x4] sm:$0xf0] }
  0x10   :  { %v314_v2 = vld [vmem:[#allocation2 + $0x4] sm:$0xf]  ;;  %v266_v3 = vor.u32 %v315_v1, %v265_v0  ;;  %v267_v4 = vld [vmem:[#allocation2 + $0x8] sm:$0xf0]  ;;  %v312_v5 = vld [vmem:[#allocation7 + $0x38] sm:$0xff]  ;;  %vm101_vm0 = vcmask 130048  }
  0x11   :  { %v270_v6 = vor.u32 %v314_v2, %v267_v4  ;;  %v313_v7 = vld [vmem:[#allocation5] sm:$0xff]  ;;  %189 = vmatpush.bf16.msra.mxu2 %v312_v5  ;;  %v311_v8 = vld [vmem:[#allocation7 + $0x30] sm:$0xff]  ;;  %207 = vmatpush.bf16.msra.mxu3 %v312_v5  ;;  %v310_v9 = vld [vmem:[#allocation7 + $0x28] sm:$0xff]  ;;  %s435_s7 = smov [#allocation8]   ;;  %s245_s11 = sshll.u32 %s482_s4, 4  ;;  %s246_s11 = int_to_ptr.hbm [resolvable:$true] %s245_s11 }
  0x12   :  { %112 = vmatpush.bf16.msra.mxu0 %v266_v3  ;;  %v309_v10 = vld [vmem:[#allocation7 + $0x20] sm:$0xff]  ;;  %v308_v11 = vld [vmem:[#allocation7 + $0x18] sm:$0xff]  ;;  %v307_v12 = vld [vmem:[#allocation7 + $0x10] sm:$0xff]  ;;  %s243_s8 = sshll.u32 %s435_s7, 4  ;;  %s437_s12 = smov 16   ;;  %s244_s8 = int_to_ptr.vmem [resolvable:$true] %s243_s8 }
  0x13   :  { %126 = vmatpush.bf16.msra.mxu1 %v270_v6  ;;  %v306_v13 = vld [vmem:[#allocation7 + $0x8] sm:$0xff]  ;;  %v305_v14 = vld [vmem:[#allocation7] sm:$0xff] }
  0x14   :  { %v221_v27 = vld [vmem:[%s481_s3] sm:$0x3]  ;;  %s436_s3 = smov 256  }
  0x15   :  { %271 = vmatmul.msk.bf16.vlgmr.msra.gmra.mxu0 %vm101_vm0, %v313_v7  ;;  %190 = vmatpush.bf16.msra.mxu2 %v311_v8  ;;  %v223_v28 = vperm.slane %v221_v27, 0  ;;  %v224_v29 = vperm.slane %v221_v27, 1 }
  0x16   :  { %272 = vmatmul.msk.bf16.vlgmr.msra.gmra.mxu1 %vm101_vm0, %v313_v7  ;;  %208 = vmatpush.bf16.msra.mxu3 %v311_v8 }
  0x19   :  { %191 = vmatpush.bf16.msra.mxu2 %v310_v9 }
  0x1a   :  { %209 = vmatpush.bf16.msra.mxu3 %v310_v9 }
  0x1d   :  { %192 = vmatpush.bf16.msra.mxu2 %v309_v10 }
  0x1e   :  { %210 = vmatpush.bf16.msra.mxu3 %v309_v10 }
  0x21   :  { %193 = vmatpush.bf16.msra.mxu2 %v308_v11 }
  0x22   :  { %211 = vmatpush.bf16.msra.mxu3 %v308_v11 }
  0x25   :  { %194 = vmatpush.bf16.msra.mxu2 %v307_v12 }
  0x26   :  { %212 = vmatpush.bf16.msra.mxu3 %v307_v12 }
  0x29   :  { %195 = vmatpush.bf16.msra.mxu2 %v306_v13 }
  0x2a   :  { %213 = vmatpush.bf16.msra.mxu3 %v306_v13 }
  0x2d   :  { %196 = vmatpush.bf16.msra.mxu2 %v305_v14 }
  0x2e   :  { %214 = vmatpush.bf16.msra.mxu3 %v305_v14 }
  0x92   :  { %v114_v15 = vpop.f32.mrf.mxu0 }
  0x93   :  { %v128_v16 = vpop.f32.mrf.mxu1 }
  0x94   :  { %v133_v17 = vpack.c.bf16 %v128_v16, %v114_v15 }
  0x96   :  { %v137_v21 = vunpack.c.l.b16 %v133_v17  ;;  %v203_v22 = vunpack.c.h.b16 %v133_v17 }
  0x9a   :  { %v116_v18 = vpop.f32.mrf.mxu0 }
  0x9b   :  { %v130_v19 = vpop.f32.mrf.mxu1 }
  0x9c   :  { %v134_v20 = vpack.c.bf16 %v130_v19, %v116_v18 }
  0x9e   :  { %v138_v23 = vunpack.c.l.b16 %v134_v20  ;;  %v204_v24 = vunpack.c.h.b16 %v134_v20 }
  0xa0   :  { %v139_v25 = vpack.c.b16 %v138_v23, %v137_v21  ;;  %v205_v26 = vpack.c.b16 %v204_v24, %v203_v22 }
  0xa2   :  { %197 = vmatmul.bf16.vlgmr.msra.gmra.mxu2 %v139_v25  ;;  %215 = vmatmul.bf16.vlgmr.msra.gmra.mxu3 %v205_v26 }
 0x125   :  { %v198_v30 = vpop.f32.mrf.mxu2  ;;  %v216_v31 = vpop.f32.mrf.mxu3 }
 0x126   :  { %v227_v32 = vadd.f32 %v223_v28, %v198_v30  ;;  %v228_v33 = vadd.f32 %v224_v29, %v216_v31 }
 0x128   :  { %v231_v34 = vmax.f32 %v227_v32, 0.0  ;;  %v232_v35 = vmax.f32 %v228_v33, 0.0 }
 0x12a   :  { %235 = vst [vmem:[#allocation8] sm:$0xff] %v231_v34 }
 0x12b   :  { %236 = vst [vmem:[#allocation8 + $0x8] sm:$0xff] %v232_v35 }
 0x12d   :  { %v200_v36 = vpop.f32.mrf.mxu2  ;;  %v218_v37 = vpop.f32.mrf.mxu3 }
 0x12e   :  { %v229_v38 = vadd.f32 %v223_v28, %v200_v36  ;;  %v230_v39 = vadd.f32 %v224_v29, %v218_v37 }
 0x130   :  { %v233_v40 = vmax.f32 %v229_v38, 0.0  ;;  %v234_v41 = vmax.f32 %v230_v39, 0.0 }
 0x132   :  { %237 = vst [vmem:[#allocation8 + $0x10] sm:$0xff] %v233_v40 }
 0x133   :  { %238 = vst [vmem:[#allocation8 + $0x18] sm:$0xff] %v234_v41 }
 0x134   :  { %251 = dma.vmem_to_hbm [thread:$0]  %s244_s8, 512, %s246_s11, [#allocation4], %s436_s3, %s436_s3, %s437_s12  }
 0x135   :  { %426 = dma.done.wait [#allocation4], 512  }
 0x136   :  { %427 = vsyncadd [#allocation4], 4294966784 }
 0x137   :  { %256 = vsyncpa [#allocation3], 1 }
 0x138   :  { %257 = vsyncpa [#allocation6], 1 }
 0x139   :  { %258 = vsyncpa [#allocation4], 1 }

</bundles_post_ra>
